<compile_context>
chip_gen: v5e
topology: v5e:2x2
jax: 0.10.0
libtpu: 0.0.40
codegen_flags: <defaults>
</compile_context>

<pallas_src>
import jax
import jax.numpy as jnp
from jax.experimental import pallas as pl
from jax.experimental.pallas import tpu as pltpu

_LANES = 512            # tile lane width (multiple of 128 -> unmasked stores)
_MAX_ROWS = 512         # max sublane rows per tile (multiple of 8); <= 1 MiB/buf f32
_PALLAS_MIN_ELEMS = 1024  # below this, XLA's fused elementwise kernel wins


def _round_up(x, m):
    return ((x + m - 1) // m) * m


def _tanh_relu_dup_kernel(x_ref, o_ref):
    # x_ref: (TM, L) input tile; o_ref: (1, TM, L) — the h-th copy's tile.
    y = jnp.tanh(x_ref[...])
    o_ref[0] = jnp.maximum(y, jnp.zeros((), y.dtype)).astype(o_ref.dtype)


def _dup_tanh_relu_pallas(x):
    """Returns relu(tanh(concatenate([x, x], axis=0))) with shape (2B, D)."""
    B, D = x.shape
    total = B * D
    L = _LANES
    rows_needed = pl.cdiv(total, L)
    tm = min(_MAX_ROWS, _round_up(rows_needed, 8))
    R = _round_up(rows_needed, tm)
    padded = R * L

    flat = jnp.reshape(x, (-1,))
    if padded != total:
        flat = jnp.pad(flat, (0, padded - total))
    slab = jnp.reshape(flat, (R, L))          # lane-dense (R, 512) view of x

    grid = (2, R // tm)                       # (copy index, row-tile index)
    out = pl.pallas_call(
        _tanh_relu_dup_kernel,
        out_shape=jax.ShapeDtypeStruct((2, R, L), x.dtype),
        grid=grid,
        in_specs=[pl.BlockSpec((tm, L), lambda h, i: (i, 0))],
        out_specs=pl.BlockSpec((1, tm, L), lambda h, i: (h, i, 0)),
        compiler_params=pltpu.CompilerParams(
            dimension_semantics=("parallel", "parallel")),
        cost_estimate=pl.CostEstimate(
            flops=2 * padded,                  # relu/max
            transcendentals=2 * padded,        # tanh per output element
            bytes_accessed=4 * padded * x.dtype.itemsize),
    )(slab)

    out = jnp.reshape(out, (2, padded))[:, :total]   # drop padding per copy
    return jnp.reshape(out, (2 * B, D))              # == relu(tanh(cat([x, x], 0)))


def model_forward(x):
    B, D = x.shape
    assert D % 2 == 0 and (4 * B) % 3 == 0, "view() constraints: D even, B % 3 == 0"

    if B * D >= _PALLAS_MIN_ELEMS:
        cat_out = _dup_tanh_relu_pallas(x)
    else:
        # Tiny inputs: the Pallas launch is pure overhead; let XLA fuse it.
        cat_out = jnp.maximum(jnp.tanh(jnp.concatenate([x, x], axis=0)), 0.0)

    # view(2 * (2B), -1) -> (4B, D//2); view(-1, 3 * (D//2)) -> (4B//3, 3D//2)
    out = jnp.reshape(cat_out, (4 * B, D // 2))
    out = jnp.reshape(out, (-1, 3 * (D // 2)))
    return out


def _reference(x):
    r = jnp.tanh(jnp.concatenate([x, x], axis=0))
    r = jnp.reshape(r, (2 * r.shape[0], -1))
    r = jnp.reshape(r, (-1, 3 * r.shape[1]))
    return jnp.maximum(r, 0.0)


if __name__ == "__main__":
    key = jax.random.PRNGKey(0)
    k_main, k_small = jax.random.split(key)

    # Small valid shape (D even, B % 3 == 0) that exercises the Pallas path.
    B, D = 24, 256
    x = jax.random.normal(k_main, (B, D), dtype=jnp.float32)

    out = jax.block_until_ready(model_forward(x))
    ref = _reference(x)
    assert out.shape == ref.shape
    assert jnp.allclose(out, ref, atol=1e-6)

    # Also exercise the tiny-shape fallback path (matches module's spirit, (6, 8)).
    x_small = jax.random.normal(k_small, (6, 8), dtype=jnp.float32)
    out_small = jax.block_until_ready(model_forward(x_small))
    assert jnp.allclose(out_small, _reference(x_small), atol=1e-6)

    print("KERNEL_OK")
</pallas_src>

<mosaic_0001>
module attributes {stable_mosaic.version = 11 : i64} {
  func.func @_tanh_relu_dup_kernel(%arg0: i32, %arg1: i32, %arg2: memref<16x512xf32, #tpu.memory_space<vmem>>, %arg3: memref<1x16x512xf32, #tpu.memory_space<vmem>>) attributes {dimension_semantics = [#tpu.dimension_semantics<parallel>, #tpu.dimension_semantics<parallel>], iteration_bounds = array<i64: 2, 1>, scalar_prefetch = 0 : i64, scratch_operands = 0 : i64, tpu.core_type = #tpu.core_type<tc>, window_params = [{transform_indices = @transform_0, window_bounds = array<i64: 16, 512>}, {transform_indices = @transform_1, window_bounds = array<i64: 1, 16, 512>}]} {
    %c0 = arith.constant 0 : index
    %c0_0 = arith.constant 0 : index
    %0 = vector.load %arg2[%c0, %c0_0] : memref<16x512xf32, #tpu.memory_space<vmem>>, vector<16x512xf32>
    %1 = math.tanh %0 : vector<16x512xf32>
    %cst = arith.constant 0.000000e+00 : f32
    %2 = vector.broadcast %cst : f32 to vector<16x512xf32>
    %3 = arith.maximumf %1, %2 : vector<16x512xf32>
    %c0_1 = arith.constant 0 : index
    %c0_2 = arith.constant 0 : index
    %c0_3 = arith.constant 0 : index
    %4 = vector.load %arg3[%c0_1, %c0_2, %c0_3] : memref<1x16x512xf32, #tpu.memory_space<vmem>>, vector<1x16x512xf32>
    %5 = vector.shape_cast %4 : vector<1x16x512xf32> to vector<16x512xf32>
    %6 = vector.shape_cast %3 : vector<16x512xf32> to vector<1x16x512xf32>
    tpu.vector_store %arg3[%c0_1, %c0_2, %c0_3], %6 {strides = array<i32>} : memref<1x16x512xf32, #tpu.memory_space<vmem>>, vector<1x16x512xf32>,
    return
  }
  func.func @transform_0(%arg0: i32, %arg1: i32) -> (i32, i32) {
    %c0_i32 = arith.constant 0 : i32
    %c0_i32_0 = arith.constant 0 : i32
    return %arg1, %c0_i32 : i32, i32
  }
  func.func @transform_1(%arg0: i32, %arg1: i32) -> (i32, i32, i32) {
    %c0_i32 = arith.constant 0 : i32
    %c0_i32_0 = arith.constant 0 : i32
    return %arg0, %arg1, %c0_i32 : i32, i32, i32
  }
}

</mosaic_0001>

<bundles_post_ra>
// kernel: tpu_custom_call.1
= control target key start
LH: loop header
LB: loop body
LE: loop exit
PB: predicated region body
PF: predicated region fallthrough
CT: control target
= control target key end

     0   :  { %6 = vsyncpa [#allocation3], 0  ;;  %s590_s0 = inlined_call_operand.hbm [shape: f32[16,512], index: 0, kind: input, shape index: {}]   ;;  %s591_s1 = inlined_call_operand.hbm [shape: f32[2,16,512], index: 1, kind: output, shape index: {}]  }
   0x1   :  { %7 = vsyncpa [#allocation4], 0 }
   0x2   :  { %9 = vsyncpa [#allocation4 + $0x1], 0  ;;  %s491_s6 = smov 0   ;;  %s493_s7 = smov 0  }
   0x3   :  { %s495_s8 = smov 0   ;;  %s497_s9 = smov 0  }
   0x4   :  { %s499_s10 = smov 0   ;;  %s501_s11 = smov 0  }
   0x5 LB: > { %s263_s12 = sadd.s32 4294967295, %s474_s11   ;;  %s264_s13 = sadd.s32 4294967294, %s474_s11   ;;  %s474_s11 = sphi %s501_s11, %s15_s11   ;;  %s470_s10 = sphi %s499_s10, %s598_s10   ;;  %s466_s9 = sphi %s497_s9, %s597_s9   ;;  %s462_s8 = sphi %s495_s8, %s596_s8   ;;  %s458_s7 = sphi %s493_s7, %s595_s7   ;;  %s454_s6 = sphi %s491_s6, %s594_s6  }
   0x6   : > { %s27_s14 = sadd.s32 1, %s470_s10  ;;  %s62_s15 = sadd.s32 1, %s462_s8 }
   0x7   : > { %p29_p0 = scmp.ge.s32.totalorder %s27_s14, 2  ;;  %p72_p1 = scmp.ne.s32.totalorder %s462_s8, %s458_s7 }
   0x8   : > { %p73_p2 = scmp.eq.s32.totalorder %s263_s12, 1  ;;  %p78_p3 = scmp.ne.s32.totalorder %s458_s7, %s454_s6 }
   0x9   : > { %s600_s14 = smov (%p29_p0, %s27_s14), 0  ;;  %p79_p5 = scmp.eq.s32.totalorder %s264_s13, 1 }
   0xa   : > { %p531_p4 = por %p73_p2, %p72_p1  ;;  %s57_s17 = ssub.s32 %s470_s10, %s600_s14 }
   0xb   : > { %p265_p6 = scmp.ge.s32.totalorder %s474_s11, 1  ;;  %p60_p7 = scmp.eq.s32.totalorder %s57_s17, 0 }
   0xc   : > { %p538_p8 = por %p79_p5, %p78_p3  ;;  %p86_p9 = scmp.lt.s32.totalorder %s474_s11, 3 }
   0xd   : > { %s544_s19 = scalar_select %p60_p7, %s462_s8, %s62_s15  }
   0xe   : > { %p87_p10 = pnand %p265_p6, %p86_p9  ;;  %p290_p11 = scmp.eq.s32.totalorder %s263_s12, 0 }
   0xf   : > { %s101_s22 = sshll.u32 %s590_s0, 4  ;;  %s476_s23 = smov [#allocation2]   ;;  %s102_s22 = int_to_ptr.hbm [resolvable:$true] %s101_s22 }
  0x10   : > { %p282_p12 = pneg %p87_p10  ;;  %s103_s24 = sshll.u32 %s476_s23, 4  ;;  %s104_s24 = int_to_ptr.vmem [resolvable:$true] %s103_s24 }
  0x11   : > { %s477_s25 = smov 512   ;;  %s478_s26 = smov 32  }
  0x12   : > { %p283_p13 = pnand %p290_p11, %p282_p12  ;;  %119 = sbr.rel (%p87_p10) target bundleno = 45 (0x2d), region = 24 }
  0x14   : > { %285 = dma.hbm_to_vmem [thread:$0]  (!%p283_p13), %s102_s22, 1024, %s104_s24, [#allocation3], %s477_s25, %s477_s25, %s478_s26  }
  0x17   : > { %445 = dma.done.wait (%p290_p11), [#allocation3], 1024  }
  0x18   : > { %447 = vsyncadd (%p290_p11), [#allocation3], 4294966272  ;;  %v137_v0 = vld [vmem:[#allocation2] sm:$0xff]  ;;  %v138_v1 = vld [vmem:[#allocation2 + $0x8] sm:$0xff]  ;;  %s132_s27 = sand.u32 1, %s458_s7   ;;  %s275_s29 = sshll.u32 %s466_s9, 6 }
  0x19   : > { %v139_v2 = vld [vmem:[#allocation2 + $0x10] sm:$0xff]  ;;  %346 = vtanh.f32 %v137_v0  ;;  %v140_v3 = vld [vmem:[#allocation2 + $0x18] sm:$0xff]  ;;  %v141_v4 = vld [vmem:[#allocation2 + $0x20] sm:$0xff]  ;;  %s269_s28 = sshll.u32 %s132_s27, 6  ;;  %s184_s3 = scalar_lea.hbm %s591_s1, %s275_s29 }
  0x1a   : > { %348 = vtanh.f32 %v138_v1  ;;  %v142_v5 = vld [vmem:[#allocation2 + $0x28] sm:$0xff]  ;;  %v143_v6 = vld [vmem:[#allocation2 + $0x30] sm:$0xff]  ;;  %v144_v7 = vld [vmem:[#allocation2 + $0x38] sm:$0xff]  ;;  %s134_s4 = scalar_lea.vmem [#allocation5], %s269_s28  ;;  %s187_s9 = sshll.u32 %s184_s3, 4  ;;  %s188_s9 = int_to_ptr.hbm [resolvable:$true] %s187_s9 }
  0x1b   : > { %350 = vtanh.f32 %v139_v2  ;;  %s185_s5 = sshll.u32 %s134_s4, 4  ;;  %s170_s12 = scalar_lea.sflag [#allocation4], %s132_s27  ;;  %s186_s5 = int_to_ptr.vmem [resolvable:$true] %s185_s5 }
  0x1c   : > { %352 = vtanh.f32 %v140_v3  ;;  %s406_s13 = sshra.s32 %s188_s9, 4  ;;  %s412_s21 = scalar_lea.hbm %s591_s1, 128  ;;  %s407_s13 = int_to_ptr.hbm [resolvable:$true] %s406_s13 }
  0x1d   : > { %354 = vtanh.f32 %v141_v4  ;;  %s408_s15 = scalar_lea.hbm %s407_s13, 64  ;;  %p413_p3 = scmp.lt.s32.totalorder %s407_s13, %s591_s1 }
  0x1e   : > { %356 = vtanh.f32 %v142_v5  ;;  %p409_p0 = scmp.ne.s32.totalorder %s407_s13, %s408_s15  ;;  %p414_p5 = scmp.lt.s32.totalorder %s412_s21, %s408_s15 }
  0x1f   : > { %v347_v8 = vpop.eup %346  ;;  %358 = vtanh.f32 %v143_v6 }
  0x20   : > { %v349_v9 = vpop.eup %348  ;;  %v153_v10 = vmax.f32 %v347_v8, 0.0  ;;  %360 = vtanh.f32 %v144_v7  ;;  %p410_p1 = pnand %p409_p0, %p531_p4  ;;  %p415_p6 = por %p414_p5, %p413_p3 }
  0x21   : > { %v351_v11 = vpop.eup %350  ;;  %v154_v12 = vmax.f32 %v349_v9, 0.0 }
  0x22   : > { %v353_v13 = vpop.eup %352  ;;  %161 = vst [vmem:[%s134_s4] sm:$0xff] %v153_v10  ;;  %v155_v14 = vmax.f32 %v351_v11, 0.0  ;;  %p411_p2 = pneg %p410_p1 }
  0x23   : > { %v355_v15 = vpop.eup %354  ;;  %162 = vst [vmem:[%s134_s4 + $0x8] sm:$0xff] %v154_v12  ;;  %v156_v16 = vmax.f32 %v353_v13, 0.0 }
  0x24   : > { %v357_v17 = vpop.eup %356  ;;  %163 = vst [vmem:[%s134_s4 + $0x10] sm:$0xff] %v155_v14  ;;  %v157_v18 = vmax.f32 %v355_v15, 0.0  ;;  %p416_p7 = pnand %p415_p6, %p411_p2 }
  0x25   : > { %v359_v19 = vpop.eup %358  ;;  %164 = vst [vmem:[%s134_s4 + $0x18] sm:$0xff] %v156_v16  ;;  %v158_v20 = vmax.f32 %v357_v17, 0.0 }
  0x26   : > { %v361_v21 = vpop.eup %360  ;;  %165 = vst [vmem:[%s134_s4 + $0x20] sm:$0xff] %v157_v18  ;;  %v159_v22 = vmax.f32 %v359_v19, 0.0 }
  0x27   : > { %166 = vst [vmem:[%s134_s4 + $0x28] sm:$0xff] %v158_v20  ;;  %v160_v23 = vmax.f32 %v361_v21, 0.0 }
  0x28   : > { %167 = vst [vmem:[%s134_s4 + $0x30] sm:$0xff] %v159_v22 }
  0x29   : > { %168 = vst [vmem:[%s134_s4 + $0x38] sm:$0xff] %v160_v23 }
  0x2a   : > { %419 = shalt.err (!%p416_p7)
}
  0x2b   : > { %s479_s24 = smov 512   ;;  %s480_s25 = smov 32  }
  0x2c   : > { %280 = dma.vmem_to_hbm [thread:$0]  (%p531_p4), %s186_s5, 1024, %s188_s9, %s170_s12, %s479_s24, %s479_s24, %s480_s25  }
  0x2d PF: > { %p292_p9 = scmp.ge.s32.totalorder %s474_s11, 2  ;;  %s202_s26 = sand.u32 1, %s454_s6  }
  0x2e   : > { %s203_s27 = scalar_lea.sflag [#allocation4], %s202_s26 }
  0x2f   : > { %p287_p10 = pnand %p292_p9, %p538_p8 }
  0x31   : > { %p288_p11 = pneg %p287_p10 }
  0x33   : > { %449 = dma.done.wait (%p288_p11), %s203_s27, 1024  }
  0x34   : > { %451 = vsyncadd (%p288_p11), %s203_s27, 4294966272  ;;  %s15_s11 = sadd.s32 1, %s474_s11   ;;  %s594_s6 = smov %s458_s7 }
  0x35   : > { %p12_p12 = scmp.ge.s32.totalorder %s15_s11, 4   ;;  %s595_s7 = smov %s462_s8 }
  0x36   : > { %s596_s8 = smov %s544_s19  ;;  %s597_s9 = smov %s470_s10 }
  0x37   : > { %s598_s10 = smov %s600_s14  ;;  %14 = sbr.rel (!%p12_p12) target bundleno = 5 (0x5), region = 62 }
  0x3c   :  { %209 = vsyncpa [#allocation3], 1 }
  0x3d   :  { %211 = vsyncpa [#allocation3 + $0x1], 1 }
  0x3e   :  { %212 = vsyncpa [#allocation4], 1 }
  0x3f   :  { %214 = vsyncpa [#allocation4 + $0x1], 1 }

</bundles_post_ra>
